<compile_context>
chip_gen: v7x
topology: tpu7x:2x2x1
jax: 0.10.0
libtpu: 0.0.40
codegen_flags: <defaults>
</compile_context>

<pallas_src>
import functools

import numpy as np

import jax
import jax.numpy as jnp
from jax.experimental import pallas as pl
from jax.experimental.pallas import tpu as pltpu


# ----------------------------------------------------------------------------
# Fused Pallas kernel (one grid step = one batch element)
# ----------------------------------------------------------------------------
def _upsample_kernel(*refs, H, W, op_h, op_w, has_se):
    if has_se:
        (x_ref, wee_ref, weo_ref, woe_ref, woo_ref, bdec_ref, wcf_ref, bconv_ref,
         rmap_ref, cmap_ref, w1_ref, b1_ref, w2_ref, b2_ref, o_ref) = refs
    else:
        (x_ref, wee_ref, weo_ref, woe_ref, woo_ref, bdec_ref, wcf_ref, bconv_ref,
         rmap_ref, cmap_ref, o_ref) = refs

    f32 = jnp.float32
    HW = H * W
    Cr = o_ref.shape[2]

    x = x_ref[0].astype(f32)                                  # (C, H*W), space on lanes

    # boundary-validity masks (computed once); rmap/cmap are host-precomputed index maps
    rmap = rmap_ref[...]                                      # (1, HW) int32, r = lane // W
    cmap = cmap_ref[...]                                      # (1, HW) int32, c = lane %  W
    m_r_up = jnp.where(rmap < (H - 1), 1.0, 0.0)              # reading row r+1 is valid
    m_r_dn = jnp.where(rmap > 0, 1.0, 0.0)                    # reading row r-1 is valid
    m_c_up = jnp.where(cmap < (W - 1), 1.0, 0.0)              # reading col c+1 is valid
    m_c_dn = jnp.where(cmap > 0, 1.0, 0.0)                    # reading col c-1 is valid

    def shift2d(a, rs, cs):
        # b[:, r*W+c] = a[:, (r+rs)*W + (c+cs)]   (zero outside [0,H) x [0,W))
        if rs == 0 and cs == 0:
            return a
        d = rs * W + cs
        b = pltpu.roll(a, shift=(-d) % HW, axis=1)            # XLU lane rotation
        mask = None
        if rs == 1:
            mask = m_r_up
        elif rs == -1:
            mask = m_r_dn
        if cs == 1:
            mask = m_c_up if mask is None else mask * m_c_up
        elif cs == -1:
            mask = m_c_dn if mask is None else mask * m_c_dn
        return b * mask

    # ---- ConvTranspose2d(k=3, s=2, p=1) via sub-pixel phases, K folded on sublanes ----
    x_r = shift2d(x, 0, 1)
    x_d = shift2d(x, 1, 0)
    x_dr = shift2d(x, 1, 1)
    b_dec = bdec_ref[...]                                     # (C, 1)

    def dec(w_ref, blocks):
        xin = blocks[0] if len(blocks) == 1 else jnp.concatenate(blocks, axis=0)
        yv = jnp.dot(w_ref[...], xin, preferred_element_type=f32)
        return jnp.maximum(yv + b_dec, 0.0)                   # deconv bias + ReLU

    y = {
        (0, 0): dec(wee_ref, [x]),                            # out[2r,   2c  ]
        (0, 1): dec(weo_ref, [x, x_r]),                       # out[2r,   2c+1]
        (1, 0): dec(woe_ref, [x, x_d]),                       # out[2r+1, 2c  ]
        (1, 1): dec(woo_ref, [x, x_d, x_r, x_dr]),            # out[2r+1, 2c+1]
    }

    # output_padding < stride-1: deconv row 2H-1 / col 2W-1 does not exist -> zero it
    if op_h == 0:
        y[(1, 0)] = y[(1, 0)] * m_r_up
        y[(1, 1)] = y[(1, 1)] * m_r_up
    if op_w == 0:
        y[(0, 1)] = y[(0, 1)] * m_c_up
        y[(1, 1)] = y[(1, 1)] * m_c_up

    # ---- 3x3 stride-1 'same' conv, phase-decomposed; one K=9C dot per output phase ----
    shifted = {}

    def get_shift(q, rs, cs):
        key = (q, rs, cs)
        if key not in shifted:
            shifted[key] = shift2d(y[q], rs, cs)
        return shifted[key]

    w_cf = wcf_ref[...]                                       # (Cr, 9C), host-folded
    b_cv = bconv_ref[...]                                     # (Cr, 1)
    z = {}
    for pr in (0, 1):
        for pc in (0, 1):
            blocks = []
            for dh in (-1, 0, 1):
                qr = (pr + dh) % 2
                rs = (pr + dh - qr) // 2
                for dw in (-1, 0, 1):
                    qc = (pc + dw) % 2
                    cs = (pc + dw - qc) // 2
                    blocks.append(get_shift((qr, qc), rs, cs))
            xf = jnp.concatenate(blocks, axis=0)              # (9C, HW), sublane concat
            zz = jnp.dot(w_cf, xf, preferred_element_type=f32) + b_cv
            z[(pr, pc)] = jnp.maximum(zz, 0.0)                # conv bias + ReLU (in vregs)

    # rows/cols beyond the requested output size must not pollute SE pooling
    if op_h == 0:
        z[(1, 0)] = z[(1, 0)] * m_r_up
        z[(1, 1)] = z[(1, 1)] * m_r_up
    if op_w == 0:
        z[(0, 1)] = z[(0, 1)] * m_c_up
        z[(1, 1)] = z[(1, 1)] * m_c_up

    # ---- fused SE epilogue: GAP -> fc1 -> ReLU -> fc2 -> sigmoid -> scale ----
    if has_se:
        Ho = 2 * H - 1 + op_h
        Wo = 2 * W - 1 + op_w
        tot = z[(0, 0)] + z[(0, 1)] + z[(1, 0)] + z[(1, 1)]
        pooled = jnp.sum(tot, axis=1, keepdims=True) * (1.0 / (Ho * Wo))   # (Cr, 1)
        p = jnp.broadcast_to(pooled, (Cr, 128))               # lane-broadcast (dot-friendly)
        h = jnp.maximum(
            jnp.dot(w1_ref[...], p, preferred_element_type=f32) + b1_ref[...], 0.0)
        s = jax.nn.sigmoid(
            jnp.dot(w2_ref[...], h, preferred_element_type=f32) + b2_ref[...])
        s1 = s[:, 0:1]                                        # (Cr, 1), all lanes equal
        for k in z:
            z[k] = z[k] * s1

    # ---- lane-dense phase-separated output slab ----
    o_ref[0, 0] = z[(0, 0)].astype(o_ref.dtype)
    o_ref[0, 1] = z[(0, 1)].astype(o_ref.dtype)
    o_ref[0, 2] = z[(1, 0)].astype(o_ref.dtype)
    o_ref[0, 3] = z[(1, 1)].astype(o_ref.dtype)


def _upsample_pallas(x2d, w_ee, w_eo, w_oe, w_oo, b_dec, w_cf, b_conv,
                     r_map, c_map, se, H, W, op_h, op_w):
    N, C, HW = x2d.shape
    Cr = w_cf.shape[0]
    has_se = se is not None

    def const2d(a):
        return pl.BlockSpec(tuple(a.shape), lambda n: (0, 0))

    in_specs = [
        pl.BlockSpec((1, C, HW), lambda n: (n, 0, 0)),
        const2d(w_ee), const2d(w_eo), const2d(w_oe), const2d(w_oo),
        const2d(b_dec), const2d(w_cf), const2d(b_conv),
        const2d(r_map), const2d(c_map),
    ]
    args = [x2d, w_ee, w_eo, w_oe, w_oo, b_dec, w_cf, b_conv, r_map, c_map]
    if has_se:
        w1t, b1, w2t, b2 = se
        in_specs += [const2d(w1t), const2d(b1), const2d(w2t), const2d(b2)]
        args += [w1t, b1, w2t, b2]

    kernel = functools.partial(_upsample_kernel, H=H, W=W,
                               op_h=op_h, op_w=op_w, has_se=has_se)
    return pl.pallas_call(
        kernel,
        out_shape=jax.ShapeDtypeStruct((N, 4, Cr, HW), jnp.float32),
        grid=(N,),
        in_specs=in_specs,
        out_specs=pl.BlockSpec((1, 4, Cr, HW), lambda n: (n, 0, 0, 0)),
        compiler_params=pltpu.CompilerParams(
            dimension_semantics=("parallel",),
            vmem_limit_bytes=32 * 1024 * 1024),
    )(*args)


# ----------------------------------------------------------------------------
# Parameters and forward pass
# ----------------------------------------------------------------------------
def init_upsample_params(key, in_channels, reduction, kernel_size=3, stride=2):
    C, K = in_channels, kernel_size
    Cr = in_channels // stride
    ks = jax.random.split(key, 8)
    params = {
        # PyTorch layouts: deconv weight (Cin, Cout, kH, kW); conv weight (Cout, Cin, kH, kW)
        "w_deconv": jax.random.normal(ks[0], (C, C, K, K), jnp.float32) * 0.1,
        "b_deconv": jax.random.normal(ks[1], (C,), jnp.float32) * 0.1,
        "w_conv": jax.random.normal(ks[2], (Cr, C, K, K), jnp.float32) * 0.1,
        "b_conv": jax.random.normal(ks[3], (Cr,), jnp.float32) * 0.1,
    }
    if reduction != -1:
        Cm = max(Cr // reduction, 1)
        params["se"] = (
            jax.random.normal(ks[4], (Cr, Cm), jnp.float32) * 0.1,
            jax.random.normal(ks[5], (Cm,), jnp.float32) * 0.1,
            jax.random.normal(ks[6], (Cm, Cr), jnp.float32) * 0.1,
            jax.random.normal(ks[7], (Cr,), jnp.float32) * 0.1,
        )
    else:
        params["se"] = None  # NoSEBlock == identity
    return params


@functools.partial(jax.jit, static_argnames=("output_size", "kernel_size", "stride", "padding"))
def upsample_forward(params, x_nchw, output_size, kernel_size=3, stride=2, padding=1):
    # The fused kernel hard-codes the module's actual config (3x3, stride 2, pad 1).
    assert kernel_size == 3 and stride == 2 and padding == 1, "unsupported configuration"
    N, C, H, W = x_nchw.shape
    Ho, Wo = output_size
    op_h = Ho - ((H - 1) * stride - 2 * padding + kernel_size)
    op_w = Wo - ((W - 1) * stride - 2 * padding + kernel_size)
    assert 0 <= op_h < stride and 0 <= op_w < stride, "invalid output_size"
    Cr = params["w_conv"].shape[0]

    # NCHW input, flattened spatial dims on the (lane) minor axis -- free reshape, no transpose.
    x2d = x_nchw.reshape(N, C, H * W)

    # Deconv weights (Cin, Cout, kH, kW) -> per-phase K-folded (Cout, k*Cin) matrices.
    wd = jnp.transpose(params["w_deconv"], (1, 0, 2, 3))       # (Cout, Cin, kH, kW)
    w_ee = wd[:, :, 1, 1]
    w_eo = jnp.concatenate([wd[:, :, 1, 2], wd[:, :, 1, 0]], axis=1)
    w_oe = jnp.concatenate([wd[:, :, 2, 1], wd[:, :, 0, 1]], axis=1)
    w_oo = jnp.concatenate([wd[:, :, 2, 2], wd[:, :, 0, 2],
                            wd[:, :, 2, 0], wd[:, :, 0, 0]], axis=1)
    b_dec = params["b_deconv"][:, None]                        # (C, 1)

    # Conv weights OIHW -> single im2col-folded (Cr, 9C); tap order (kh, kw), channel fastest.
    w_cf = jnp.transpose(params["w_conv"], (0, 2, 3, 1)).reshape(Cr, 9 * C)
    b_conv = params["b_conv"][:, None]                         # (Cr, 1)

    # Host-precomputed row / col index maps (avoid in-kernel integer div/mod).
    lane = np.arange(H * W, dtype=np.int32)
    r_map = (lane // W).astype(np.int32)[None, :]
    c_map = (lane % W).astype(np.int32)[None, :]

    se = params["se"]
    se_t = None
    if se is not None:
        w1, b1, w2, b2 = se
        se_t = (w1.T, b1[:, None], w2.T, b2[:, None])

    out_ph = _upsample_pallas(x2d, w_ee, w_eo, w_oe, w_oo, b_dec, w_cf, b_conv,
                              r_map, c_map, se_t, H, W, op_h, op_w)

    # Depth-to-space (phase interleave) + trim in XLA; output is already channel-major (NCHW).
    out = out_ph.reshape(N, 2, 2, Cr, H, W)
    out = jnp.transpose(out, (0, 3, 4, 1, 5, 2)).reshape(N, Cr, 2 * H, 2 * W)
    return out[:, :, :Ho, :Wo]


# ----------------------------------------------------------------------------
# Pure-JAX reference (independent dilated-conv formulation) for numerical checks
# ----------------------------------------------------------------------------
def _dilate_and_pad_for_deconv(x_nhwc, stride, kernel_size, padding, op_h, op_w):
    N, H, W, C = x_nhwc.shape
    Hd, Wd = (H - 1) * stride + 1, (W - 1) * stride + 1
    xd = jnp.zeros((N, Hd, Wd, C), x_nhwc.dtype)
    xd = xd.at[:, ::stride, ::stride, :].set(x_nhwc)
    lo = kernel_size - 1 - padding
    return jnp.pad(xd, ((0, 0), (lo, lo + op_h), (lo, lo + op_w), (0, 0)))


def _ref_conv3x3_relu(xp, w_hwio, b):
    y = jax.lax.conv_general_dilated(
        xp, w_hwio, window_strides=(1, 1), padding="VALID",
        dimension_numbers=("NHWC", "HWIO", "NHWC"))
    return jnp.maximum(y + b[None, None, None, :], 0.0)


def upsample_reference(params, x_nchw, output_size, kernel_size=3, stride=2, padding=1):
    N, C, H, W = x_nchw.shape
    Ho, Wo = output_size
    op_h = Ho - ((H - 1) * stride - 2 * padding + kernel_size)
    op_w = Wo - ((W - 1) * stride - 2 * padding + kernel_size)
    x = jnp.transpose(x_nchw, (0, 2, 3, 1))
    xdp = _dilate_and_pad_for_deconv(x, stride, kernel_size, padding, op_h, op_w)
    w_dec = jnp.transpose(jnp.flip(params["w_deconv"], axis=(2, 3)), (2, 3, 0, 1))
    out = _ref_conv3x3_relu(xdp, w_dec, params["b_deconv"])
    out_p = jnp.pad(out, ((0, 0), (1, 1), (1, 1), (0, 0)))
    w_conv = jnp.transpose(params["w_conv"], (2, 3, 1, 0))
    out = _ref_conv3x3_relu(out_p, w_conv, params["b_conv"])
    if params["se"] is not None:
        w1, b1, w2, b2 = params["se"]
        pooled = jnp.mean(out, axis=(1, 2))
        h = jnp.maximum(pooled @ w1 + b1, 0.0)
        s = jax.nn.sigmoid(h @ w2 + b2)
        out = out * s[:, None, None, :]
    return jnp.transpose(out, (0, 3, 1, 2))


# ----------------------------------------------------------------------------
if __name__ == "__main__":
    # batch=2, in_channels=8, spatial 16x16 -> upsampled to 32x32, out channels 4
    N, C, H, W = 2, 8, 16, 16
    output_size = (2 * H, 2 * W)

    key = jax.random.PRNGKey(0)
    kp, kx = jax.random.split(key)
    x = jax.random.normal(kx, (N, C, H, W), jnp.float32)

    # SE path (reduction=2)
    params = init_upsample_params(kp, in_channels=C, reduction=2)
    out = jax.block_until_ready(upsample_forward(params, x, output_size))
    expected_shape = (N, C // 2, output_size[0], output_size[1])
    assert out.shape == expected_shape, (out.shape, expected_shape)
    ref = upsample_reference(params, x, output_size)
    err = float(jnp.max(jnp.abs(out - ref)))
    assert jnp.allclose(out, ref, atol=5e-3, rtol=5e-3), err

    # NoSEBlock path (reduction=-1, identity)
    params_id = init_upsample_params(kp, in_channels=C, reduction=-1)
    out_id = jax.block_until_ready(upsample_forward(params_id, x, output_size))
    ref_id = upsample_reference(params_id, x, output_size)
    err_id = float(jnp.max(jnp.abs(out_id - ref_id)))
    assert jnp.allclose(out_id, ref_id, atol=5e-3, rtol=5e-3), err_id

    # Odd output size (output_padding = 0 on both axes), SE path
    odd_size = (2 * H - 1, 2 * W - 1)
    out_odd = jax.block_until_ready(upsample_forward(params, x, odd_size))
    ref_odd = upsample_reference(params, x, odd_size)
    err_odd = float(jnp.max(jnp.abs(out_odd - ref_odd)))
    assert out_odd.shape == (N, C // 2, odd_size[0], odd_size[1])
    assert jnp.allclose(out_odd, ref_odd, atol=5e-3, rtol=5e-3), err_odd

    print("KERNEL_OK")
</pallas_src>

<mosaic_0001>
module attributes {stable_mosaic.version = 11 : i64} {
  func.func @_upsample_kernel(%arg0: i32, %arg1: memref<1x8x256xf32, #tpu.memory_space<vmem>>, %arg2: memref<8x8xf32, #tpu.memory_space<vmem>>, %arg3: memref<8x16xf32, #tpu.memory_space<vmem>>, %arg4: memref<8x16xf32, #tpu.memory_space<vmem>>, %arg5: memref<8x32xf32, #tpu.memory_space<vmem>>, %arg6: memref<8x1xf32, #tpu.memory_space<vmem>>, %arg7: memref<4x72xf32, #tpu.memory_space<vmem>>, %arg8: memref<4x1xf32, #tpu.memory_space<vmem>>, %arg9: memref<1x256xi32, #tpu.memory_space<vmem>>, %arg10: memref<1x256xi32, #tpu.memory_space<vmem>>, %arg11: memref<2x4xf32, #tpu.memory_space<vmem>>, %arg12: memref<2x1xf32, #tpu.memory_space<vmem>>, %arg13: memref<4x2xf32, #tpu.memory_space<vmem>>, %arg14: memref<4x1xf32, #tpu.memory_space<vmem>>, %arg15: memref<1x4x4x256xf32, #tpu.memory_space<vmem>>) attributes {dimension_semantics = [#tpu.dimension_semantics<parallel>], iteration_bounds = array<i64: 2>, scalar_prefetch = 0 : i64, scratch_operands = 0 : i64, tpu.core_type = #tpu.core_type<tc>, window_params = [{transform_indices = @transform_0, window_bounds = array<i64: 1, 8, 256>}, {pipeline_mode = #tpu.pipeline_mode<synchronous>, transform_indices = @transform_1, window_bounds = array<i64: 8, 8>}, {pipeline_mode = #tpu.pipeline_mode<synchronous>, transform_indices = @transform_2, window_bounds = array<i64: 8, 16>}, {pipeline_mode = #tpu.pipeline_mode<synchronous>, transform_indices = @transform_3, window_bounds = array<i64: 8, 16>}, {pipeline_mode = #tpu.pipeline_mode<synchronous>, transform_indices = @transform_4, window_bounds = array<i64: 8, 32>}, {pipeline_mode = #tpu.pipeline_mode<synchronous>, transform_indices = @transform_5, window_bounds = array<i64: 8, 1>}, {pipeline_mode = #tpu.pipeline_mode<synchronous>, transform_indices = @transform_6, window_bounds = array<i64: 4, 72>}, {pipeline_mode = #tpu.pipeline_mode<synchronous>, transform_indices = @transform_7, window_bounds = array<i64: 4, 1>}, {pipeline_mode = #tpu.pipeline_mode<synchronous>, transform_indices = @transform_8, window_bounds = array<i64: 1, 256>}, {pipeline_mode = #tpu.pipeline_mode<synchronous>, transform_indices = @transform_9, window_bounds = array<i64: 1, 256>}, {pipeline_mode = #tpu.pipeline_mode<synchronous>, transform_indices = @transform_10, window_bounds = array<i64: 2, 4>}, {pipeline_mode = #tpu.pipeline_mode<synchronous>, transform_indices = @transform_11, window_bounds = array<i64: 2, 1>}, {pipeline_mode = #tpu.pipeline_mode<synchronous>, transform_indices = @transform_12, window_bounds = array<i64: 4, 2>}, {pipeline_mode = #tpu.pipeline_mode<synchronous>, transform_indices = @transform_13, window_bounds = array<i64: 4, 1>}, {transform_indices = @transform_14, window_bounds = array<i64: 1, 4, 4, 256>}]} {
    %c0 = arith.constant 0 : index
    %c0_0 = arith.constant 0 : index
    %c0_1 = arith.constant 0 : index
    %0 = vector.load %arg1[%c0, %c0_0, %c0_1] : memref<1x8x256xf32, #tpu.memory_space<vmem>>, vector<1x8x256xf32>
    %1 = vector.shape_cast %0 : vector<1x8x256xf32> to vector<8x256xf32>
    %c0_2 = arith.constant 0 : index
    %c0_3 = arith.constant 0 : index
    %2 = vector.load %arg9[%c0_2, %c0_3] : memref<1x256xi32, #tpu.memory_space<vmem>>, vector<1x256xi32>
    %c0_4 = arith.constant 0 : index
    %c0_5 = arith.constant 0 : index
    %3 = vector.load %arg10[%c0_4, %c0_5] : memref<1x256xi32, #tpu.memory_space<vmem>>, vector<1x256xi32>
    %c15_i32 = arith.constant 15 : i32
    %4 = vector.broadcast %c15_i32 : i32 to vector<1x256xi32>
    %5 = arith.cmpi slt, %2, %4 : vector<1x256xi32>
    %cst = arith.constant 1.000000e+00 : f32
    %cst_6 = arith.constant 0.000000e+00 : f32
    %6 = vector.broadcast %cst : f32 to vector<1x256xf32>
    %7 = vector.broadcast %cst_6 : f32 to vector<1x256xf32>
    %8 = arith.select %5, %6, %7 : vector<1x256xi1>, vector<1x256xf32>
    %c0_i32 = arith.constant 0 : i32
    %9 = vector.broadcast %c0_i32 : i32 to vector<1x256xi32>
    %10 = arith.cmpi sgt, %2, %9 : vector<1x256xi32>
    %cst_7 = arith.constant 1.000000e+00 : f32
    %cst_8 = arith.constant 0.000000e+00 : f32
    %11 = vector.broadcast %cst_7 : f32 to vector<1x256xf32>
    %12 = vector.broadcast %cst_8 : f32 to vector<1x256xf32>
    %13 = arith.select %10, %11, %12 : vector<1x256xi1>, vector<1x256xf32>
    %c15_i32_9 = arith.constant 15 : i32
    %14 = vector.broadcast %c15_i32_9 : i32 to vector<1x256xi32>
    %15 = arith.cmpi slt, %3, %14 : vector<1x256xi32>
    %cst_10 = arith.constant 1.000000e+00 : f32
    %cst_11 = arith.constant 0.000000e+00 : f32
    %16 = vector.broadcast %cst_10 : f32 to vector<1x256xf32>
    %17 = vector.broadcast %cst_11 : f32 to vector<1x256xf32>
    %18 = arith.select %15, %16, %17 : vector<1x256xi1>, vector<1x256xf32>
    %c0_i32_12 = arith.constant 0 : i32
    %19 = vector.broadcast %c0_i32_12 : i32 to vector<1x256xi32>
    %20 = arith.cmpi sgt, %3, %19 : vector<1x256xi32>
    %cst_13 = arith.constant 1.000000e+00 : f32
    %cst_14 = arith.constant 0.000000e+00 : f32
    %21 = vector.broadcast %cst_13 : f32 to vector<1x256xf32>
    %22 = vector.broadcast %cst_14 : f32 to vector<1x256xf32>
    %23 = arith.select %20, %21, %22 : vector<1x256xi1>, vector<1x256xf32>
    %c255_i32 = arith.constant 255 : i32
    %24 = tpu.dynamic_rotate %1 by %c255_i32 dim 1 : vector<8x256xf32>, i32 -> vector<8x256xf32>
    %25 = vector.broadcast %18 : vector<1x256xf32> to vector<8x256xf32>
    %26 = arith.mulf %24, %25 : vector<8x256xf32>
    %c240_i32 = arith.constant 240 : i32
    %27 = tpu.dynamic_rotate %1 by %c240_i32 dim 1 : vector<8x256xf32>, i32 -> vector<8x256xf32>
    %28 = vector.broadcast %8 : vector<1x256xf32> to vector<8x256xf32>
    %29 = arith.mulf %27, %28 : vector<8x256xf32>
    %c239_i32 = arith.constant 239 : i32
    %30 = tpu.dynamic_rotate %1 by %c239_i32 dim 1 : vector<8x256xf32>, i32 -> vector<8x256xf32>
    %31 = arith.mulf %8, %18 : vector<1x256xf32>
    %32 = vector.broadcast %31 : vector<1x256xf32> to vector<8x256xf32>
    %33 = arith.mulf %30, %32 : vector<8x256xf32>
    %c0_15 = arith.constant 0 : index
    %c0_16 = arith.constant 0 : index
    %34 = vector.load %arg6[%c0_15, %c0_16] : memref<8x1xf32, #tpu.memory_space<vmem>>, vector<8x1xf32>
    %c0_17 = arith.constant 0 : index
    %c0_18 = arith.constant 0 : index
    %35 = vector.load %arg2[%c0_17, %c0_18] : memref<8x8xf32, #tpu.memory_space<vmem>>, vector<8x8xf32>
    %cst_19 = arith.constant dense<0.000000e+00> : vector<8x256xf32>
    %36 = tpu.matmul %35, %1, %cst_19 {dimension_numbers = #tpu.dot_dimension_numbers<[1], [0], [0], [1], [0, 0, 1, 1], [], []>} : vector<8x8xf32>, vector<8x256xf32>, vector<8x256xf32> -> vector<8x256xf32>
    %37 = vector.broadcast %34 : vector<8x1xf32> to vector<8x256xf32>
    %38 = arith.addf %36, %37 : vector<8x256xf32>
    %cst_20 = arith.constant 0.000000e+00 : f32
    %39 = vector.broadcast %cst_20 : f32 to vector<8x256xf32>
    %40 = arith.maximumf %38, %39 : vector<8x256xf32>
    %41 = tpu.concatenate %1, %26 in 0 : vector<8x256xf32>, vector<8x256xf32> -> vector<16x256xf32>
    %c0_21 = arith.constant 0 : index
    %c0_22 = arith.constant 0 : index
    %42 = vector.load %arg3[%c0_21, %c0_22] : memref<8x16xf32, #tpu.memory_space<vmem>>, vector<8x16xf32>
    %cst_23 = arith.constant dense<0.000000e+00> : vector<8x256xf32>
    %43 = tpu.matmul %42, %41, %cst_23 {dimension_numbers = #tpu.dot_dimension_numbers<[1], [0], [0], [1], [0, 0, 1, 1], [], []>} : vector<8x16xf32>, vector<16x256xf32>, vector<8x256xf32> -> vector<8x256xf32>
    %44 = vector.broadcast %34 : vector<8x1xf32> to vector<8x256xf32>
    %45 = arith.addf %43, %44 : vector<8x256xf32>
    %cst_24 = arith.constant 0.000000e+00 : f32
    %46 = vector.broadcast %cst_24 : f32 to vector<8x256xf32>
    %47 = arith.maximumf %45, %46 : vector<8x256xf32>
    %48 = tpu.concatenate %1, %29 in 0 : vector<8x256xf32>, vector<8x256xf32> -> vector<16x256xf32>
    %c0_25 = arith.constant 0 : index
    %c0_26 = arith.constant 0 : index
    %49 = vector.load %arg4[%c0_25, %c0_26] : memref<8x16xf32, #tpu.memory_space<vmem>>, vector<8x16xf32>
    %cst_27 = arith.constant dense<0.000000e+00> : vector<8x256xf32>
    %50 = tpu.matmul %49, %48, %cst_27 {dimension_numbers = #tpu.dot_dimension_numbers<[1], [0], [0], [1], [0, 0, 1, 1], [], []>} : vector<8x16xf32>, vector<16x256xf32>, vector<8x256xf32> -> vector<8x256xf32>
    %51 = vector.broadcast %34 : vector<8x1xf32> to vector<8x256xf32>
    %52 = arith.addf %50, %51 : vector<8x256xf32>
    %cst_28 = arith.constant 0.000000e+00 : f32
    %53 = vector.broadcast %cst_28 : f32 to vector<8x256xf32>
    %54 = arith.maximumf %52, %53 : vector<8x256xf32>
    %55 = tpu.concatenate %1, %29, %26, %33 in 0 : vector<8x256xf32>, vector<8x256xf32>, vector<8x256xf32>, vector<8x256xf32> -> vector<32x256xf32>
    %c0_29 = arith.constant 0 : index
    %c0_30 = arith.constant 0 : index
    %56 = vector.load %arg5[%c0_29, %c0_30] : memref<8x32xf32, #tpu.memory_space<vmem>>, vector<8x32xf32>
    %cst_31 = arith.constant dense<0.000000e+00> : vector<8x256xf32>
    %57 = tpu.matmul %56, %55, %cst_31 {dimension_numbers = #tpu.dot_dimension_numbers<[1], [0], [0], [1], [0, 0, 1, 1], [], []>} : vector<8x32xf32>, vector<32x256xf32>, vector<8x256xf32> -> vector<8x256xf32>
    %58 = vector.broadcast %34 : vector<8x1xf32> to vector<8x256xf32>
    %59 = arith.addf %57, %58 : vector<8x256xf32>
    %cst_32 = arith.constant 0.000000e+00 : f32
    %60 = vector.broadcast %cst_32 : f32 to vector<8x256xf32>
    %61 = arith.maximumf %59, %60 : vector<8x256xf32>
    %c0_33 = arith.constant 0 : index
    %c0_34 = arith.constant 0 : index
    %62 = vector.load %arg7[%c0_33, %c0_34] : memref<4x72xf32, #tpu.memory_space<vmem>>, vector<4x72xf32>
    %c0_35 = arith.constant 0 : index
    %c0_36 = arith.constant 0 : index
    %63 = vector.load %arg8[%c0_35, %c0_36] : memref<4x1xf32, #tpu.memory_space<vmem>>, vector<4x1xf32>
    %c17_i32 = arith.constant 17 : i32
    %64 = tpu.dynamic_rotate %61 by %c17_i32 dim 1 : vector<8x256xf32>, i32 -> vector<8x256xf32>
    %65 = arith.mulf %13, %23 : vector<1x256xf32>
    %66 = vector.broadcast %65 : vector<1x256xf32> to vector<8x256xf32>
    %67 = arith.mulf %64, %66 : vector<8x256xf32>
    %c16_i32 = arith.constant 16 : i32
    %68 = tpu.dynamic_rotate %54 by %c16_i32 dim 1 : vector<8x256xf32>, i32 -> vector<8x256xf32>
    %69 = vector.broadcast %13 : vector<1x256xf32> to vector<8x256xf32>
    %70 = arith.mulf %68, %69 : vector<8x256xf32>
    %c16_i32_37 = arith.constant 16 : i32
    %71 = tpu.dynamic_rotate %61 by %c16_i32_37 dim 1 : vector<8x256xf32>, i32 -> vector<8x256xf32>
    %72 = vector.broadcast %13 : vector<1x256xf32> to vector<8x256xf32>
    %73 = arith.mulf %71, %72 : vector<8x256xf32>
    %c1_i32 = arith.constant 1 : i32
    %74 = tpu.dynamic_rotate %47 by %c1_i32 dim 1 : vector<8x256xf32>, i32 -> vector<8x256xf32>
    %75 = vector.broadcast %23 : vector<1x256xf32> to vector<8x256xf32>
    %76 = arith.mulf %74, %75 : vector<8x256xf32>
    %c1_i32_38 = arith.constant 1 : i32
    %77 = tpu.dynamic_rotate %61 by %c1_i32_38 dim 1 : vector<8x256xf32>, i32 -> vector<8x256xf32>
    %78 = vector.broadcast %23 : vector<1x256xf32> to vector<8x256xf32>
    %79 = arith.mulf %77, %78 : vector<8x256xf32>
    %80 = tpu.concatenate %67, %70, %73, %76, %40, %47, %79, %54, %61 in 0 : vector<8x256xf32>, vector<8x256xf32>, vector<8x256xf32>, vector<8x256xf32>, vector<8x256xf32>, vector<8x256xf32>, vector<8x256xf32>, vector<8x256xf32>, vector<8x256xf32> -> vector<72x256xf32>
    %cst_39 = arith.constant dense<0.000000e+00> : vector<4x256xf32>
    %81 = tpu.matmul %62, %80, %cst_39 {dimension_numbers = #tpu.dot_dimension_numbers<[1], [0], [0], [1], [0, 0, 1, 1], [], []>} : vector<4x72xf32>, vector<72x256xf32>, vector<4x256xf32> -> vector<4x256xf32>
    %82 = vector.broadcast %63 : vector<4x1xf32> to vector<4x256xf32>
    %83 = arith.addf %81, %82 : vector<4x256xf32>
    %cst_40 = arith.constant 0.000000e+00 : f32
    %84 = vector.broadcast %cst_40 : f32 to vector<4x256xf32>
    %85 = arith.maximumf %83, %84 : vector<4x256xf32>
    %c15_i32_41 = arith.constant 15 : i32
    %86 = tpu.dynamic_rotate %54 by %c15_i32_41 dim 1 : vector<8x256xf32>, i32 -> vector<8x256xf32>
    %87 = arith.mulf %13, %18 : vector<1x256xf32>
    %88 = vector.broadcast %87 : vector<1x256xf32> to vector<8x256xf32>
    %89 = arith.mulf %86, %88 : vector<8x256xf32>
    %c255_i32_42 = arith.constant 255 : i32
    %90 = tpu.dynamic_rotate %40 by %c255_i32_42 dim 1 : vector<8x256xf32>, i32 -> vector<8x256xf32>
    %91 = vector.broadcast %18 : vector<1x256xf32> to vector<8x256xf32>
    %92 = arith.mulf %90, %91 : vector<8x256xf32>
    %c255_i32_43 = arith.constant 255 : i32
    %93 = tpu.dynamic_rotate %54 by %c255_i32_43 dim 1 : vector<8x256xf32>, i32 -> vector<8x256xf32>
    %94 = vector.broadcast %18 : vector<1x256xf32> to vector<8x256xf32>
    %95 = arith.mulf %93, %94 : vector<8x256xf32>
    %96 = tpu.concatenate %70, %73, %89, %40, %47, %92, %54, %61, %95 in 0 : vector<8x256xf32>, vector<8x256xf32>, vector<8x256xf32>, vector<8x256xf32>, vector<8x256xf32>, vector<8x256xf32>, vector<8x256xf32>, vector<8x256xf32>, vector<8x256xf32> -> vector<72x256xf32>
    %cst_44 = arith.constant dense<0.000000e+00> : vector<4x256xf32>
    %97 = tpu.matmul %62, %96, %cst_44 {dimension_numbers = #tpu.dot_dimension_numbers<[1], [0], [0], [1], [0, 0, 1, 1], [], []>} : vector<4x72xf32>, vector<72x256xf32>, vector<4x256xf32> -> vector<4x256xf32>
    %98 = vector.broadcast %63 : vector<4x1xf32> to vector<4x256xf32>
    %99 = arith.addf %97, %98 : vector<4x256xf32>
    %cst_45 = arith.constant 0.000000e+00 : f32
    %100 = vector.broadcast %cst_45 : f32 to vector<4x256xf32>
    %101 = arith.maximumf %99, %100 : vector<4x256xf32>
    %c241_i32 = arith.constant 241 : i32
    %102 = tpu.dynamic_rotate %47 by %c241_i32 dim 1 : vector<8x256xf32>, i32 -> vector<8x256xf32>
    %103 = arith.mulf %8, %23 : vector<1x256xf32>
    %104 = vector.broadcast %103 : vector<1x256xf32> to vector<8x256xf32>
    %105 = arith.mulf %102, %104 : vector<8x256xf32>
    %c240_i32_46 = arith.constant 240 : i32
    %106 = tpu.dynamic_rotate %40 by %c240_i32_46 dim 1 : vector<8x256xf32>, i32 -> vector<8x256xf32>
    %107 = vector.broadcast %8 : vector<1x256xf32> to vector<8x256xf32>
    %108 = arith.mulf %106, %107 : vector<8x256xf32>
    %c240_i32_47 = arith.constant 240 : i32
    %109 = tpu.dynamic_rotate %47 by %c240_i32_47 dim 1 : vector<8x256xf32>, i32 -> vector<8x256xf32>
    %110 = vector.broadcast %8 : vector<1x256xf32> to vector<8x256xf32>
    %111 = arith.mulf %109, %110 : vector<8x256xf32>
    %112 = tpu.concatenate %76, %40, %47, %79, %54, %61, %105, %108, %111 in 0 : vector<8x256xf32>, vector<8x256xf32>, vector<8x256xf32>, vector<8x256xf32>, vector<8x256xf32>, vector<8x256xf32>, vector<8x256xf32>, vector<8x256xf32>, vector<8x256xf32> -> vector<72x256xf32>
    %cst_48 = arith.constant dense<0.000000e+00> : vector<4x256xf32>
    %113 = tpu.matmul %62, %112, %cst_48 {dimension_numbers = #tpu.dot_dimension_numbers<[1], [0], [0], [1], [0, 0, 1, 1], [], []>} : vector<4x72xf32>, vector<72x256xf32>, vector<4x256xf32> -> vector<4x256xf32>
    %114 = vector.broadcast %63 : vector<4x1xf32> to vector<4x256xf32>
    %115 = arith.addf %113, %114 : vector<4x256xf32>
    %cst_49 = arith.constant 0.000000e+00 : f32
    %116 = vector.broadcast %cst_49 : f32 to vector<4x256xf32>
    %117 = arith.maximumf %115, %116 : vector<4x256xf32>
    %c239_i32_50 = arith.constant 239 : i32
    %118 = tpu.dynamic_rotate %40 by %c239_i32_50 dim 1 : vector<8x256xf32>, i32 -> vector<8x256xf32>
    %119 = arith.mulf %8, %18 : vector<1x256xf32>
    %120 = vector.broadcast %119 : vector<1x256xf32> to vector<8x256xf32>
    %121 = arith.mulf %118, %120 : vector<8x256xf32>
    %122 = tpu.concatenate %40, %47, %92, %54, %61, %95, %108, %111, %121 in 0 : vector<8x256xf32>, vector<8x256xf32>, vector<8x256xf32>, vector<8x256xf32>, vector<8x256xf32>, vector<8x256xf32>, vector<8x256xf32>, vector<8x256xf32>, vector<8x256xf32> -> vector<72x256xf32>
    %cst_51 = arith.constant dense<0.000000e+00> : vector<4x256xf32>
    %123 = tpu.matmul %62, %122, %cst_51 {dimension_numbers = #tpu.dot_dimension_numbers<[1], [0], [0], [1], [0, 0, 1, 1], [], []>} : vector<4x72xf32>, vector<72x256xf32>, vector<4x256xf32> -> vector<4x256xf32>
    %124 = vector.broadcast %63 : vector<4x1xf32> to vector<4x256xf32>
    %125 = arith.addf %123, %124 : vector<4x256xf32>
    %cst_52 = arith.constant 0.000000e+00 : f32
    %126 = vector.broadcast %cst_52 : f32 to vector<4x256xf32>
    %127 = arith.maximumf %125, %126 : vector<4x256xf32>
    %128 = arith.addf %85, %101 : vector<4x256xf32>
    %129 = arith.addf %128, %117 : vector<4x256xf32>
    %130 = arith.addf %129, %127 : vector<4x256xf32>
    %cst_53 = arith.constant dense<0.000000e+00> : vector<4xf32>
    %131 = vector.multi_reduction <add>, %130, %cst_53 [1] : vector<4x256xf32> to vector<4xf32>
    %132 = vector.shape_cast %131 : vector<4xf32> to vector<4x1xf32>
    %cst_54 = arith.constant 9.765625E-4 : f32
    %133 = vector.broadcast %cst_54 : f32 to vector<4x1xf32>
    %134 = arith.mulf %132, %133 : vector<4x1xf32>
    %135 = vector.shape_cast %134 : vector<4x1xf32> to vector<4x1xf32>
    %136 = vector.broadcast %135 : vector<4x1xf32> to vector<4x128xf32>
    %c0_55 = arith.constant 0 : index
    %c0_56 = arith.constant 0 : index
    %137 = vector.load %arg11[%c0_55, %c0_56] : memref<2x4xf32, #tpu.memory_space<vmem>>, vector<2x4xf32>
    %cst_57 = arith.constant dense<0.000000e+00> : vector<2x128xf32>
    %138 = tpu.matmul %137, %136, %cst_57 {dimension_numbers = #tpu.dot_dimension_numbers<[1], [0], [0], [1], [0, 0, 1, 1], [], []>} : vector<2x4xf32>, vector<4x128xf32>, vector<2x128xf32> -> vector<2x128xf32>
    %c0_58 = arith.constant 0 : index
    %c0_59 = arith.constant 0 : index
    %139 = vector.load %arg12[%c0_58, %c0_59] : memref<2x1xf32, #tpu.memory_space<vmem>>, vector<2x1xf32>
    %140 = vector.broadcast %139 : vector<2x1xf32> to vector<2x128xf32>
    %141 = arith.addf %138, %140 : vector<2x128xf32>
    %cst_60 = arith.constant 0.000000e+00 : f32
    %142 = vector.broadcast %cst_60 : f32 to vector<2x128xf32>
    %143 = arith.maximumf %141, %142 : vector<2x128xf32>
    %c0_61 = arith.constant 0 : index
    %c0_62 = arith.constant 0 : index
    %144 = vector.load %arg13[%c0_61, %c0_62] : memref<4x2xf32, #tpu.memory_space<vmem>>, vector<4x2xf32>
    %cst_63 = arith.constant dense<0.000000e+00> : vector<4x128xf32>
    %145 = tpu.matmul %144, %143, %cst_63 {dimension_numbers = #tpu.dot_dimension_numbers<[1], [0], [0], [1], [0, 0, 1, 1], [], []>} : vector<4x2xf32>, vector<2x128xf32>, vector<4x128xf32> -> vector<4x128xf32>
    %c0_64 = arith.constant 0 : index
    %c0_65 = arith.constant 0 : index
    %146 = vector.load %arg14[%c0_64, %c0_65] : memref<4x1xf32, #tpu.memory_space<vmem>>, vector<4x1xf32>
    %147 = vector.broadcast %146 : vector<4x1xf32> to vector<4x128xf32>
    %148 = arith.addf %145, %147 : vector<4x128xf32>
    %149 = arith.negf %148 : vector<4x128xf32>
    %150 = math.exp %149 : vector<4x128xf32>
    %cst_66 = arith.constant 1.000000e+00 : f32
    %151 = vector.broadcast %cst_66 : f32 to vector<4x128xf32>
    %152 = arith.addf %151, %150 : vector<4x128xf32>
    %153 = arith.divf %151, %152 : vector<4x128xf32>
    %154 = vector.extract_strided_slice %153 {offsets = [0, 0], sizes = [4, 1], strides = [1, 1]} : vector<4x128xf32> to vector<4x1xf32>
    %155 = vector.broadcast %154 : vector<4x1xf32> to vector<4x256xf32>
    %156 = arith.mulf %85, %155 : vector<4x256xf32>
    %157 = vector.broadcast %154 : vector<4x1xf32> to vector<4x256xf32>
    %158 = arith.mulf %101, %157 : vector<4x256xf32>
    %159 = vector.broadcast %154 : vector<4x1xf32> to vector<4x256xf32>
    %160 = arith.mulf %117, %159 : vector<4x256xf32>
    %161 = vector.broadcast %154 : vector<4x1xf32> to vector<4x256xf32>
    %162 = arith.mulf %127, %161 : vector<4x256xf32>
    %c0_67 = arith.constant 0 : index
    %c0_68 = arith.constant 0 : index
    %c0_69 = arith.constant 0 : index
    %c0_70 = arith.constant 0 : index
    %163 = vector.load %arg15[%c0_67, %c0_68, %c0_69, %c0_70] : memref<1x4x4x256xf32, #tpu.memory_space<vmem>>, vector<1x1x4x256xf32>
    %164 = vector.shape_cast %163 : vector<1x1x4x256xf32> to vector<4x256xf32>
    %165 = vector.shape_cast %156 : vector<4x256xf32> to vector<1x1x4x256xf32>
    tpu.vector_store %arg15[%c0_67, %c0_68, %c0_69, %c0_70], %165 {strides = array<i32>} : memref<1x4x4x256xf32, #tpu.memory_space<vmem>>, vector<1x1x4x256xf32>,
    %c0_71 = arith.constant 0 : index
    %c1 = arith.constant 1 : index
    %c0_72 = arith.constant 0 : index
    %c0_73 = arith.constant 0 : index
    %166 = vector.load %arg15[%c0_71, %c1, %c0_72, %c0_73] : memref<1x4x4x256xf32, #tpu.memory_space<vmem>>, vector<1x1x4x256xf32>
    %167 = vector.shape_cast %166 : vector<1x1x4x256xf32> to vector<4x256xf32>
    %168 = vector.shape_cast %158 : vector<4x256xf32> to vector<1x1x4x256xf32>
    tpu.vector_store %arg15[%c0_71, %c1, %c0_72, %c0_73], %168 {strides = array<i32>} : memref<1x4x4x256xf32, #tpu.memory_space<vmem>>, vector<1x1x4x256xf32>,
    %c0_74 = arith.constant 0 : index
    %c2 = arith.constant 2 : index
    %c0_75 = arith.constant 0 : index
    %c0_76 = arith.constant 0 : index
    %169 = vector.load %arg15[%c0_74, %c2, %c0_75, %c0_76] : memref<1x4x4x256xf32, #tpu.memory_space<vmem>>, vector<1x1x4x256xf32>
    %170 = vector.shape_cast %169 : vector<1x1x4x256xf32> to vector<4x256xf32>
    %171 = vector.shape_cast %160 : vector<4x256xf32> to vector<1x1x4x256xf32>
    tpu.vector_store %arg15[%c0_74, %c2, %c0_75, %c0_76], %171 {strides = array<i32>} : memref<1x4x4x256xf32, #tpu.memory_space<vmem>>, vector<1x1x4x256xf32>,
    %c0_77 = arith.constant 0 : index
    %c3 = arith.constant 3 : index
    %c0_78 = arith.constant 0 : index
    %c0_79 = arith.constant 0 : index
    %172 = vector.load %arg15[%c0_77, %c3, %c0_78, %c0_79] : memref<1x4x4x256xf32, #tpu.memory_space<vmem>>, vector<1x1x4x256xf32>
    %173 = vector.shape_cast %172 : vector<1x1x4x256xf32> to vector<4x256xf32>
    %174 = vector.shape_cast %162 : vector<4x256xf32> to vector<1x1x4x256xf32>
    tpu.vector_store %arg15[%c0_77, %c3, %c0_78, %c0_79], %174 {strides = array<i32>} : memref<1x4x4x256xf32, #tpu.memory_space<vmem>>, vector<1x1x4x256xf32>,
    return
  }
  func.func @transform_0(%arg0: i32) -> (i32, i32, i32) {
    %c0_i32 = arith.constant 0 : i32
    %c0_i32_0 = arith.constant 0 : i32
    %c0_i32_1 = arith.constant 0 : i32
    return %arg0, %c0_i32, %c0_i32_0 : i32, i32, i32
  }
  func.func @transform_1(%arg0: i32) -> (i32, i32) {
    %c0_i32 = arith.constant 0 : i32
    %c0_i32_0 = arith.constant 0 : i32
    %c0_i32_1 = arith.constant 0 : i32
    return %c0_i32, %c0_i32_0 : i32, i32
  }
  func.func @transform_2(%arg0: i32) -> (i32, i32) {
    %c0_i32 = arith.constant 0 : i32
    %c0_i32_0 = arith.constant 0 : i32
    %c0_i32_1 = arith.constant 0 : i32
    return %c0_i32, %c0_i32_0 : i32, i32
  }
  func.func @transform_3(%arg0: i32) -> (i32, i32) {
    %c0_i32 = arith.constant 0 : i32
    %c0_i32_0 = arith.constant 0 : i32
    %c0_i32_1 = arith.constant 0 : i32
    return %c0_i32, %c0_i32_0 : i32, i32
  }
  func.func @transform_4(%arg0: i32) -> (i32, i32) {
    %c0_i32 = arith.constant 0 : i32
    %c0_i32_0 = arith.constant 0 : i32
    %c0_i32_1 = arith.constant 0 : i32
    return %c0_i32, %c0_i32_0 : i32, i32
  }
  func.func @transform_5(%arg0: i32) -> (i32, i32) {
    %c0_i32 = arith.constant 0 : i32
    %c0_i32_0 = arith.constant 0 : i32
    %c0_i32_1 = arith.constant 0 : i32
    return %c0_i32, %c0_i32_0 : i32, i32
  }
  func.func @transform_6(%arg0: i32) -> (i32, i32) {
    %c0_i32 = arith.constant 0 : i32
    %c0_i32_0 = arith.constant 0 : i32
    %c0_i32_1 = arith.constant 0 : i32
    return %c0_i32, %c0_i32_0 : i32, i32
  }
  func.func @transform_7(%arg0: i32) -> (i32, i32) {
    %c0_i32 = arith.constant 0 : i32
    %c0_i32_0 = arith.constant 0 : i32
    %c0_i32_1 = arith.constant 0 : i32
    return %c0_i32, %c0_i32_0 : i32, i32
  }
  func.func @transform_8(%arg0: i32) -> (i32, i32) {
    %c0_i32 = arith.constant 0 : i32
    %c0_i32_0 = arith.constant 0 : i32
    %c0_i32_1 = arith.constant 0 : i32
    return %c0_i32, %c0_i32_0 : i32, i32
  }
  func.func @transform_9(%arg0: i32) -> (i32, i32) {
    %c0_i32 = arith.constant 0 : i32
    %c0_i32_0 = arith.constant 0 : i32
    %c0_i32_1 = arith.constant 0 : i32
    return %c0_i32, %c0_i32_0 : i32, i32
  }
  func.func @transform_10(%arg0: i32) -> (i32, i32) {
    %c0_i32 = arith.constant 0 : i32
    %c0_i32_0 = arith.constant 0 : i32
    %c0_i32_1 = arith.constant 0 : i32
    return %c0_i32, %c0_i32_0 : i32, i32
  }
  func.func @transform_11(%arg0: i32) -> (i32, i32) {
    %c0_i32 = arith.constant 0 : i32
    %c0_i32_0 = arith.constant 0 : i32
    %c0_i32_1 = arith.constant 0 : i32
    return %c0_i32, %c0_i32_0 : i32, i32
  }
  func.func @transform_12(%arg0: i32) -> (i32, i32) {
    %c0_i32 = arith.constant 0 : i32
    %c0_i32_0 = arith.constant 0 : i32
    %c0_i32_1 = arith.constant 0 : i32
    return %c0_i32, %c0_i32_0 : i32, i32
  }
  func.func @transform_13(%arg0: i32) -> (i32, i32) {
    %c0_i32 = arith.constant 0 : i32
    %c0_i32_0 = arith.constant 0 : i32
    %c0_i32_1 = arith.constant 0 : i32
    return %c0_i32, %c0_i32_0 : i32, i32
  }
  func.func @transform_14(%arg0: i32) -> (i32, i32, i32, i32) {
    %c0_i32 = arith.constant 0 : i32
    %c0_i32_0 = arith.constant 0 : i32
    %c0_i32_1 = arith.constant 0 : i32
    %c0_i32_2 = arith.constant 0 : i32
    return %arg0, %c0_i32, %c0_i32_0, %c0_i32_1 : i32, i32, i32, i32
  }
}

</mosaic_0001>

<bundles_post_ra>
// kernel: upsample_forward.1
= control target key start
LH: loop header
LB: loop body
LE: loop exit
PB: predicated region body
PF: predicated region fallthrough
CT: control target
= control target key end

     0   :  { %s1843_s29 = smov 0   ;;  %s2181_s0 = inlined_call_operand.vmem [shape: f32[2,8,256], index: 0, kind: input, shape index: {}]   ;;  %s2182_s1 = inlined_call_operand.vmem [shape: f32[8,8], index: 1, kind: input, shape index: {}]   ;;  %s2183_s2 = inlined_call_operand.vmem [shape: f32[8,16], index: 2, kind: input, shape index: {}]   ;;  %s2184_s3 = inlined_call_operand.vmem [shape: f32[8,16], index: 3, kind: input, shape index: {}]   ;;  %s2185_s4 = inlined_call_operand.vmem [shape: f32[8,32], index: 4, kind: input, shape index: {}]   ;;  %s2186_s5 = inlined_call_operand.vmem [shape: f32[8,1], index: 5, kind: input, shape index: {}]   ;;  %s2187_s6 = inlined_call_operand.vmem [shape: f32[4,72], index: 6, kind: input, shape index: {}]   ;;  %s2188_s7 = inlined_call_operand.vmem [shape: f32[4,1], index: 7, kind: input, shape index: {}]   ;;  %s2189_s8 = inlined_call_operand.vmem [shape: s32[1,256], index: 8, kind: input, shape index: {}]   ;;  %s2190_s9 = inlined_call_operand.vmem [shape: s32[1,256], index: 9, kind: input, shape index: {}]   ;;  %s2191_s10 = inlined_call_operand.vmem [shape: f32[2,4], index: 10, kind: input, shape index: {}]   ;;  %s2192_s11 = inlined_call_operand.vmem [shape: f32[2,1], index: 11, kind: input, shape index: {}]   ;;  %s2193_s12 = inlined_call_operand.vmem [shape: f32[4,2], index: 12, kind: input, shape index: {}]   ;;  %s2194_s13 = inlined_call_operand.vmem [shape: f32[4,1], index: 13, kind: input, shape index: {}]   ;;  %s2195_s14 = inlined_call_operand.vmem [shape: f32[2,4,4,256], index: 14, kind: output, shape index: {}]  }
   0x1 LB: > { %s1602_s30 = sadd.s32 4294967295, %s1755_s29   ;;  %p1606_p0 = scmp.ge.s32.totalorder %s1755_s29, 1  ;;  %s1755_s29 = sphi %s1843_s29, %s24_s29  }
   0x2   : > { %p412_p1 = scmp.lt.s32.totalorder %s1755_s29, 3 }
   0x4   : > { %p413_p2 = pnand %p1606_p0, %p412_p1 }
   0x5   : > { %p458_p3 = scmp.lt.s32.totalorder (!%p413_p2), %s1602_s30, 1  ;;  %v1757_v0 = vmov (!%p413_p2), 0.0   ;;  %s1758_s19 = smov (!%p413_p2), 112   ;;  %v544_v3 = vld [vmem:[%s2182_s1] sm:$0xff] (!%p413_p2)  ;;  %vm550_vm0 = vcmask (!%p413_p2), 64512   ;;  %v1761_v4 = vmov (!%p413_p2), 0   ;;  %v484_v6 = vlaneseq (!%p413_p2) }
   0x6   : > { %416 = sbr.rel (%p413_p2) target bundleno = 1495 (0x5d7), region = 76  ;;  %618 = vmatprep.mubr.f32.mxu0 (!%p413_p2), %v1757_v0  ;;  %696 = vmatprep.mubr.f32.mxu1 (!%p413_p2), %v1757_v0  ;;  %s1759_s20 = smov (!%p413_p2), 127   ;;  %v543_v5 = vld [vmem:[%s2186_s5] sm:$0xff] (!%p413_p2)  ;;  %vm628_vm6 = vcmask (!%p413_p2), 130048   ;;  %vm783_vm7 = vcmask (!%p413_p2), 261120   ;;  %vm944_vm14 = vcmask (!%p413_p2), 588800  }
   0x7   : > { %s1760_s23 = smov (!%p413_p2), 111   ;;  %1744 = vset.pattern.permute.xlu0 (!%p413_p2), %v1761_v4  ;;  %v1881_v7 = vld [vmem:[%s2189_s8] sm:$0x3] (!%p413_p2)  ;;  %v491_v9 = vshrl.u32 (!%p413_p2), %v484_v6, 7  ;;  %v1890_v10 = vand.u32 (!%p413_p2), 127, %v484_v6  ;;  %s1762_s25 = smov (!%p413_p2), 16  }
   0x8   : > { %v1886_v8 = vld [vmem:[%s2190_s9] sm:$0x3] (!%p413_p2)  ;;  %vm472_vm1 = vcmp.lt.s32.totalorder (!%p413_p2), %v1881_v7, 15  ;;  %s1763_s26 = smov (!%p413_p2), 1   ;;  %s1764_s27 = smov (!%p413_p2), 17   ;;  %vm474_vm8 = vcmp.gt.s32.totalorder (!%p413_p2), %v1881_v7, 0 }
   0x9   : > { %vm476_vm2 = vcmp.lt.s32.totalorder (!%p413_p2), %v1886_v8, 15  ;;  %v1892_v11 = vsub.s32 (!%p413_p2), 0, %v491_v9  ;;  %v1894_v12 = vsub.s32 (!%p413_p2), 1, %v491_v9  ;;  %v1897_v13 = vsel (!%p413_p2), %vm472_vm1, 1.0, %v1757_v0  ;;  %v627_v43 = vld [vmem:[%s2183_s2] sm:$0xff] (!%p413_p2)  ;;  %s1765_s28 = smov (!%p413_p2), 15  }
   0xa   : > { %v1900_v14 = vsel (!%p413_p2), %vm476_vm2, 1.0, %v1757_v0  ;;  %vm506_vm3 = vcmp.lt.s32.totalorder (!%p413_p2), %v1890_v10, 112  ;;  %vm486_vm4 = vcmp.lt.s32.totalorder (!%p413_p2), %v1890_v10, 127  ;;  %vm526_vm5 = vcmp.lt.s32.totalorder (!%p413_p2), %v1890_v10, 111  ;;  %v705_v44 = vld [vmem:[%s2184_s3] sm:$0xff] (!%p413_p2) }
   0xb   : > { %v529_v17 = vmul.f32 (!%p413_p2), %v1900_v14, %v1897_v13  ;;  %v1908_v18 = vrot.slane (!%p413_p2), %v1897_v13, %v1892_v11  ;;  %v1912_v19 = vrot.slane (!%p413_p2), %v1897_v13, %v1894_v12  ;;  %v1916_v20 = vrot.slane (!%p413_p2), %v1900_v14, %v1892_v11  ;;  %v782_v48 = vld [vmem:[%s2185_s4] sm:$0xff] (!%p413_p2) }
   0xc   : > { %v1920_v21 = vrot.slane (!%p413_p2), %v1900_v14, %v1894_v12  ;;  %vm478_vm9 = vcmp.gt.s32.totalorder (!%p413_p2), %v1886_v8, 0  ;;  %vm887_vm10 = vcmp.lt.s32.totalorder (!%p413_p2), %v1890_v10, 16  ;;  %vm866_vm11 = vcmp.lt.s32.totalorder (!%p413_p2), %v1890_v10, 17 }
   0xd   : > { %s2197_s30 = smov (!%p458_p3, %s1602_s30), 1  ;;  %v1924_v24 = vrot.slane %v529_v17, %v1894_v12  ;;  %v1941_v39 = vrot.slane %v529_v17, %v1892_v11  ;;  %vm915_vm12 = vcmp.lt.s32.totalorder %v1890_v10, 1  ;;  %vm1025_vm13 = vcmp.lt.s32.totalorder %v1890_v10, 15 }
   0xe   : > { %s1629_s15 = sshll.u32 %s2197_s30, 4  ;;  %vm1135_vm15 = vcmp.lt.s32.totalorder %v1890_v10, 113  ;;  %vm1767_vm1 = vmmov 0   ;;  %vm1342_vm2 = vcmask 31744  }
   0xf   : > { %s462_s18 = scalar_lea.vmem %s2181_s0, %s1629_s15  ;;  %s1766_s15 = smov 113  }
  0x10   : > { %v1859_v1 = vld [vmem:[%s462_s18] sm:$0xff]  ;;  %v469_v2 = vld [vmem:[%s462_s18 + $0x8] sm:$0xff] }
  0x11   : > { %502 = vrot.lane.b32.xlu1 %v1859_v1, %s1758_s19  ;;  %480 = vrot.lane.b32.xlu0 %v1859_v1, %s1759_s20 }
  0x12   : > { %554 = vmatprep.subr.mxu0 %v469_v2 }
  0x13   : > { %555 = vmatpush1.msra.mxu0 %v1859_v1 }
  0x14   : > { %1611 = vmatmul.mubr.msk.f32.vlgmr.msra.gmra.mrb[0].mxu0 %vm550_vm0, %v544_v3  ;;  %vm1328_vm0 = vcmask 1043456  }
  0x15   : > { %504 = vrot.lane.b32.xlu1 %v469_v2, %s1758_s19  ;;  %482 = vrot.lane.b32.xlu0 %v469_v2, %s1759_s20 }
  0x16   : > { %773 = vmatprep.mubr.f32.mxu0 %v1757_v0 }
  0x19   : > { %524 = vrot.lane.b32.xlu1 %v469_v2, %s1760_s23  ;;  %522 = vrot.lane.b32.xlu0 %v1859_v1, %s1760_s23 }
  0x1d   : > { %547 = vperm.xlu0 %1744, %v543_v5  }
  0x83   : > { %v503_v15 = vpop.permute.xlu1 %502  ;;  %v481_v16 = vpop.permute.xlu0 %480 }
  0x87   : > { %v505_v22 = vpop.permute.xlu1 %504  ;;  %v483_v23 = vpop.permute.xlu0 %482 }
  0x88   : > { %v507_v25 = vsel %vm506_vm3, %v503_v15, %v505_v22  ;;  %v508_v26 = vsel %vm506_vm3, %v505_v22, %v503_v15  ;;  %v487_v27 = vsel %vm486_vm4, %v481_v16, %v483_v23  ;;  %v488_v28 = vsel %vm486_vm4, %v483_v23, %v481_v16  ;;  %v861_v22 = vld [vmem:[%s2188_s7] sm:$0xf] }
  0x89   : > { %v520_v29 = vmul.f32 %v1908_v18, %v507_v25  ;;  %v521_v30 = vmul.f32 %v1912_v19, %v508_v26  ;;  %v500_v31 = vmul.f32 %v1916_v20, %v487_v27  ;;  %v501_v32 = vmul.f32 %v1920_v21, %v488_v28  ;;  %v1336_v23 = vld [vmem:[%s2192_s11] sm:$0x3] }
  0x8a   : > { %v1421_v25 = vld [vmem:[%s2194_s13] sm:$0xf] }
  0x8b   : > { %v1651_v33 = vpack.c.bf16 %v520_v29, %v1859_v1  ;;  %v525_v34 = vpop.permute.xlu1 %524  ;;  %v523_v35 = vpop.permute.xlu0 %522  ;;  %v1645_v36 = vpack.c.bf16 %v501_v32, %v469_v2  ;;  %v1649_v37 = vpack.c.bf16 %v521_v30, %v469_v2  ;;  %v1647_v38 = vpack.c.bf16 %v500_v31, %v1859_v1 }
  0x8c   : > { %v528_v40 = vsel %vm526_vm5, %v525_v34, %v523_v35  ;;  %v527_v41 = vsel %vm526_vm5, %v523_v35, %v525_v34  ;;  %v475_v30 = vsel %vm474_vm8, 1.0, %v1757_v0 }
  0x8d   : > { %v542_v42 = vmul.f32 %v1924_v24, %v528_v40  ;;  %1646 = vmatprep.subr.bf16.mxu1 %v1645_v36  ;;  %1650 = vmatprep.subr.bf16.mxu0 %v1649_v37  ;;  %v541_v45 = vmul.f32 %v1941_v39, %v527_v41  ;;  %v894_v35 = vrot.slane %v475_v30, %v1892_v11 }
  0x8e   : > { %1648 = vmatpush1.bf16.msra.mxu1 %v1647_v38  ;;  %1652 = vmatpush1.bf16.msra.mxu0 %v1651_v33  ;;  %v898_v36 = vrot.slane %v475_v30, %v1894_v12 }
  0x8f   : > { %1654 = vmatprep.subr.bf16.mxu1 %v1649_v37  ;;  %v1657_v46 = vpack.c.bf16 %v542_v42, %v501_v32  ;;  %v1659_v47 = vpack.c.bf16 %v541_v45, %v500_v31  ;;  %v2024_v31 = vsel %vm478_vm9, 1.0, %v1757_v0 }
  0x90   : > { %v869_v32 = vmul.f32 %v2024_v31, %v475_v30  ;;  %v922_v41 = vrot.slane %v2024_v31, %v1892_v11 }
  0x91   : > { %1612 = vmatmul.mubr.msk.f32.vlgmr.msra.gmra.mrb[0].mxu1 %vm628_vm6, %v627_v43  ;;  %1613 = vmatmul.mubr.msk.f32.vlgmr.msra.gmra.mrb[2].mxu0 %vm628_vm6, %v705_v44  ;;  %v926_v43 = vrot.slane %v2024_v31, %v1894_v12 }
  0x92   : > { %1656 = vmatpush1.bf16.msra.mxu1 %v1651_v33  ;;  %851 = vmatprep.mubr.f32.mxu1 %v1757_v0  ;;  %v874_v7 = vrot.slane %v869_v32, %v1892_v11  ;;  %v878_v8 = vrot.slane %v869_v32, %v1894_v12 }
  0x93   : > { %1658 = vmatprep.subr.bf16.mxu1 %v1657_v46  ;;  %1012 = vmatprep.mubr.f32.mxu0 %v1757_v0  ;;  %v1028_v46 = vmul.f32 %v1900_v14, %v475_v30 }
  0x96   : > { %1660 = vmatpush1.bf16.msra.mxu1 %v1659_v47 }
  0x99   : > { %1614 = vmatmul.mubr.msk.f32.vlgmr.msra.gmra.mrb[2].mxu1 %vm783_vm7, %v782_v48 }
  0x9a   : > { %1122 = vmatprep.mubr.f32.mxu1 %v1757_v0 }
  0x9c   : > { %v548_v51 = vpop.permute.xlu0 %547 }
  0xe7   : > { %v620_v49 = vpop.f32.mrb[0].mxu0 }
  0xe8   : > { %v622_v50 = vpop.f32.mrb[1].mxu0  ;;  %v621_v6 = vadd.f32 %v620_v49, %v548_v51 }
  0xe9   : > { %v623_v16 = vadd.f32 %v622_v50, %v548_v51 }
  0xea   : > { %v1981_v15 = vmax.f32 %v621_v6, 0.0 }
  0xeb   : > { %v1988_v17 = vmax.f32 %v623_v16, 0.0 }
 0x164   : > { %v698_v52 = vpop.f32.mrb[0].mxu1  ;;  %v775_v53 = vpop.f32.mrb[2].mxu0 }
 0x165   : > { %v776_v54 = vadd.f32 %v775_v53, %v548_v51  ;;  %v700_v55 = vpop.f32.mrb[1].mxu1  ;;  %v777_v56 = vpop.f32.mrb[3].mxu0  ;;  %v699_v58 = vadd.f32 %v698_v52, %v548_v51 }
 0x166   : > { %v778_v57 = vadd.f32 %v777_v56, %v548_v51  ;;  %v701_v60 = vadd.f32 %v700_v55, %v548_v51 }
 0x167   : > { %v1961_v59 = vmax.f32 %v776_v54, 0.0  ;;  %v1967_v62 = vmax.f32 %v699_v58, 0.0  ;;  %v1033_v58 = vrot.slane %v1028_v46, %v1892_v11 }
 0x168   : > { %v1963_v61 = vmax.f32 %v778_v57, 0.0  ;;  %v1969_v63 = vmax.f32 %v701_v60, 0.0  ;;  %v1037_v60 = vrot.slane %v1028_v46, %v1894_v12 }
 0x169   : > { %883 = vrot.lane.b32.xlu0 %v1961_v59, %s1762_s25 }
 0x16a   : > { %885 = vrot.lane.b32.xlu1 %v1963_v61, %s1762_s25  ;;  %v1669_v32 = vpack.c.bf16 %v1969_v63, %v1988_v17 }
 0x16c   : > { %v853_v1 = vpop.f32.mrb[2].mxu1 }
 0x16d   : > { %v854_v2 = vadd.f32 %v853_v1, %v548_v51  ;;  %v855_v3 = vpop.f32.mrb[3].mxu1  ;;  %911 = vrot.lane.b32.xlu0 %v1967_v62, %s1763_s26 }
 0x16e   : > { %913 = vrot.lane.b32.xlu1 %v1969_v63, %s1763_s26  ;;  %v856_v5 = vadd.f32 %v855_v3, %v548_v51 }
 0x16f   : > { %v1973_v4 = vmax.f32 %v854_v2, 0.0 }
 0x170   : > { %v1977_v9 = vmax.f32 %v856_v5, 0.0 }
 0x171   : > { %903 = vrot.lane.b32.xlu0 %v1973_v4, %s1762_s25 }
 0x172   : > { %862 = vrot.lane.b32.xlu1 %v1973_v4, %s1764_s27 }
 0x175   : > { %1021 = vrot.lane.b32.xlu0 %v1961_v59, %s1765_s28 }
 0x176   : > { %864 = vrot.lane.b32.xlu1 %v1977_v9, %s1764_s27 }
 0x179   : > { %1042 = vrot.lane.b32.xlu0 %v1981_v15, %s1759_s20 }
 0x17a   : > { %905 = vrot.lane.b32.xlu1 %v1977_v9, %s1762_s25 }
 0x17d   : > { %931 = vrot.lane.b32.xlu0 %v1973_v4, %s1763_s26 }
 0x17e   : > { %1023 = vrot.lane.b32.xlu1 %v1963_v61, %s1765_s28  ;;  %s1630_s28 = sshll.u32 %s2197_s30, 5 }
 0x17f   : > { %s467_s17 = scalar_lea.vmem %s2195_s14, %s1630_s28 }
 0x181   : > { %1050 = vrot.lane.b32.xlu0 %v1961_v59, %s1759_s20 }
 0x182   : > { %1044 = vrot.lane.b32.xlu1 %v1988_v17, %s1759_s20 }
 0x185   : > { %1131 = vrot.lane.b32.xlu0 %v1967_v62, %s1766_s15 }
 0x186   : > { %933 = vrot.lane.b32.xlu1 %v1977_v9, %s1763_s26 }
 0x189   : > { %1152 = vrot.lane.b32.xlu0 %v1981_v15, %s1758_s19 }
 0x18a   : > { %1052 = vrot.lane.b32.xlu1 %v1963_v61, %s1759_s20 }
 0x18d   : > { %1160 = vrot.lane.b32.xlu0 %v1967_v62, %s1758_s19 }
 0x18e   : > { %1133 = vrot.lane.b32.xlu1 %v1969_v63, %s1766_s15 }
 0x191   : > { %1241 = vrot.lane.b32.xlu0 %v1981_v15, %s1760_s23 }
 0x192   : > { %1154 = vrot.lane.b32.xlu1 %v1988_v17, %s1758_s19 }
 0x195   : > { %941 = vperm.xlu0 %1744, %v861_v22  }
 0x196   : > { %1162 = vrot.lane.b32.xlu1 %v1969_v63, %s1758_s19 }
 0x199   : > { %1339 = vperm.xlu0 %1744, %v1336_v23  }
 0x19a   : > { %1243 = vrot.lane.b32.xlu1 %v1988_v17, %s1760_s23 }
 0x19d   : > { %1424 = vperm.xlu0 %1744, %v1421_v25  }
 0x1db   : > { %v884_v26 = vpop.permute.xlu0 %883 }
 0x1dc   : > { %v886_v27 = vpop.permute.xlu1 %885 }
 0x1dd   : > { %v888_v37 = vsel %vm887_vm10, %v884_v26, %v886_v27  ;;  %v889_v38 = vsel %vm887_vm10, %v886_v27, %v884_v26 }
 0x1de   : > { %v901_v47 = vmul.f32 %v894_v35, %v889_v38  ;;  %v902_v48 = vmul.f32 %v898_v36, %v888_v37  ;;  %v1671_v37 = vpack.c.bf16 %v1967_v62, %v1981_v15 }
 0x1df   : > { %v912_v28 = vpop.permute.xlu0 %911 }
 0x1e0   : > { %v914_v29 = vpop.permute.xlu1 %913 }
 0x1e1   : > { %v916_v51 = vsel %vm915_vm12, %v912_v28, %v914_v29  ;;  %v917_v52 = vsel %vm915_vm12, %v914_v29, %v912_v28 }
 0x1e2   : > { %v2054_v1 = vmul.f32 %v922_v41, %v917_v52  ;;  %v2056_v2 = vmul.f32 %v926_v43, %v916_v51 }
 0x1e3   : > { %v904_v33 = vpop.permute.xlu0 %903 }
 0x1e4   : > { %v863_v34 = vpop.permute.xlu1 %862 }
 0x1e7   : > { %v1022_v40 = vpop.permute.xlu0 %1021 }
 0x1e8   : > { %v865_v42 = vpop.permute.xlu1 %864 }
 0x1e9   : > { %v867_v44 = vsel %vm866_vm11, %v863_v34, %v865_v42  ;;  %v868_v45 = vsel %vm866_vm11, %v865_v42, %v863_v34 }
 0x1ea   : > { %v881_v49 = vmul.f32 %v874_v7, %v868_v45  ;;  %v882_v50 = vmul.f32 %v878_v8, %v867_v44 }
 0x1eb   : > { %v1043_v53 = vpop.permute.xlu0 %1042 }
 0x1ec   : > { %v1663_v54 = vpack.c.bf16 %v901_v47, %v881_v49  ;;  %v906_v55 = vpop.permute.xlu1 %905  ;;  %v1661_v56 = vpack.c.bf16 %v902_v48, %v882_v50  ;;  %v1689_v50 = vpack.c.bf16 %v1977_v9, %v1963_v61 }
 0x1ed   : > { %v907_v57 = vsel %vm887_vm10, %v904_v33, %v906_v55  ;;  %v908_v14 = vsel %vm887_vm10, %v906_v55, %v904_v33 }
 0x1ee   : > { %v909_v3 = vmul.f32 %v908_v14, %v894_v35  ;;  %v910_v5 = vmul.f32 %v907_v57, %v898_v36  ;;  %1662 = vmatprep.subr.bf16.mxu0 %v1661_v56  ;;  %v1691_v56 = vpack.c.bf16 %v1973_v4, %v1961_v59 }
 0x1ef   : > { %1664 = vmatpush1.bf16.msra.mxu0 %v1663_v54  ;;  %v932_v6 = vpop.permute.xlu0 %931 }
 0x1f0   : > { %v1667_v16 = vpack.c.bf16 %v2054_v1, %v909_v3  ;;  %v1679_v22 = vpack.c.bf16 %v909_v3, %v901_v47  ;;  %v1024_v23 = vpop.permute.xlu1 %1023  ;;  %v1665_v25 = vpack.c.bf16 %v2056_v2, %v910_v5  ;;  %v1677_v26 = vpack.c.bf16 %v910_v5, %v902_v48 }
 0x1f1   : > { %v1026_v27 = vsel %vm1025_vm13, %v1022_v40, %v1024_v23  ;;  %v1027_v28 = vsel %vm1025_vm13, %v1024_v23, %v1022_v40  ;;  %v1138_v3 = vmul.f32 %v2024_v31, %v1897_v13  ;;  %v1695_v5 = vpack.c.bf16 %v1981_v15, %v2054_v1 }
 0x1f2   : > { %v1040_v29 = vmul.f32 %v1033_v58, %v1027_v28  ;;  %v1041_v30 = vmul.f32 %v1037_v60, %v1026_v27  ;;  %1666 = vmatprep.subr.bf16.mxu0 %v1665_v25  ;;  %1678 = vmatprep.subr.bf16.mxu1 %v1677_v26  ;;  %v2101_v60 = vld [vmem:[%s2187_s6] sm:$0xf] }
 0x1f3   : > { %1668 = vmatpush1.bf16.msra.mxu0 %v1667_v16  ;;  %1680 = vmatpush1.bf16.msra.mxu1 %v1679_v22  ;;  %v1051_v36 = vpop.permute.xlu0 %1050  ;;  %v1147_v1 = vrot.slane %v1138_v3, %v1894_v12  ;;  %v1143_v23 = vrot.slane %v1138_v3, %v1892_v11 }
 0x1f4   : > { %v1683_v33 = vpack.c.bf16 %v1981_v15, %v1040_v29  ;;  %v1045_v34 = vpop.permute.xlu1 %1044  ;;  %1670 = vmatprep.subr.bf16.mxu0 %v1669_v32  ;;  %v1681_v35 = vpack.c.bf16 %v1988_v17, %v1041_v30 }
 0x1f5   : > { %v1046_v7 = vsel %vm486_vm4, %v1043_v53, %v1045_v34  ;;  %v1047_v8 = vsel %vm486_vm4, %v1045_v34, %v1043_v53 }
 0x1f6   : > { %v2075_v38 = vmul.f32 %v1046_v7, %v1916_v20  ;;  %v1049_v40 = vmul.f32 %v1047_v8, %v1920_v21  ;;  %1682 = vmatprep.subr.bf16.mxu1 %v1681_v35 }
 0x1f7   : > { %1672 = vmatpush1.bf16.msra.mxu0 %v1671_v37  ;;  %1684 = vmatpush1.bf16.msra.mxu1 %v1683_v33  ;;  %v1132_v51 = vpop.permute.xlu0 %1131 }
 0x1f8   : > { %v1687_v42 = vpack.c.bf16 %v2075_v38, %v1967_v62  ;;  %v934_v44 = vpop.permute.xlu1 %933  ;;  %v1685_v45 = vpack.c.bf16 %v1049_v40, %v1969_v63  ;;  %v1715_v15 = vpack.c.bf16 %v1961_v59, %v2075_v38 }
 0x1f9   : > { %v935_v46 = vsel %vm915_vm12, %v932_v6, %v934_v44  ;;  %v936_v47 = vsel %vm915_vm12, %v934_v44, %v932_v6 }
 0x1fa   : > { %v937_v48 = vmul.f32 %v936_v47, %v922_v41  ;;  %v938_v49 = vmul.f32 %v935_v46, %v926_v43  ;;  %1686 = vmatprep.subr.bf16.mxu1 %v1685_v45 }
 0x1fb   : > { %1688 = vmatpush1.bf16.msra.mxu1 %v1687_v42  ;;  %v1153_v14 = vpop.permute.xlu0 %1152 }
 0x1fc   : > { %v1675_v52 = vpack.c.bf16 %v1961_v59, %v937_v48  ;;  %v1053_v53 = vpop.permute.xlu1 %1052  ;;  %1690 = vmatprep.subr.bf16.mxu1 %v1689_v50  ;;  %v1673_v54 = vpack.c.bf16 %v1963_v61, %v938_v49  ;;  %v1697_v13 = vpack.c.bf16 %v938_v49, %v1969_v63 }
 0x1fd   : > { %v1055_v55 = vsel %vm486_vm4, %v1053_v53, %v1051_v36  ;;  %v1054_v41 = vsel %vm486_vm4, %v1051_v36, %v1053_v53  ;;  %vm1427_vm4 = vcmask 15360  }
 0x1fe   : > { %v1057_v43 = vmul.f32 %v1055_v55, %v1920_v21  ;;  %1674 = vmatprep.subr.bf16.mxu0 %v1673_v54  ;;  %v1056_v58 = vmul.f32 %v1054_v41, %v1916_v20  ;;  %v1693_v21 = vpack.c.bf16 %v1988_v17, %v2056_v2  ;;  %v1713_v20 = vpack.c.bf16 %v1963_v61, %v1049_v40 }
 0x1ff   : > { %1676 = vmatpush1.bf16.msra.mxu0 %v1675_v52  ;;  %1692 = vmatpush1.bf16.msra.mxu1 %v1691_v56  ;;  %v1161_v31 = vpop.permute.xlu0 %1160  ;;  %v1699_v2 = vpack.c.bf16 %v937_v48, %v1967_v62 }
 0x200   : > { %v1134_v57 = vpop.permute.xlu1 %1133  ;;  %964 = vmatprep.subr.mxu0 %v1977_v9  ;;  %1074 = vmatprep.subr.mxu1 %v1057_v43  ;;  %v1717_v61 = vpack.c.bf16 %v1057_v43, %v1977_v9  ;;  %v1719_v27 = vpack.c.bf16 %v1056_v58, %v1973_v4 }
 0x201   : > { %v1137_v63 = vsel %vm1135_vm15, %v1134_v57, %v1132_v51  ;;  %v1136_v9 = vsel %vm1135_vm15, %v1132_v51, %v1134_v57 }
 0x202   : > { %v1151_v26 = vmul.f32 %v1147_v1, %v1137_v63  ;;  %v1150_v34 = vmul.f32 %v1143_v23, %v1136_v9  ;;  %v1335_v1 = vld [vmem:[%s2191_s10] sm:$0x3] }
 0x203   : > { %965 = vmatpush1.msra.mxu0 %v1973_v4  ;;  %1075 = vmatpush1.msra.mxu1 %v1056_v58  ;;  %v1242_v33 = vpop.permute.xlu0 %1241 }
 0x204   : > { %v1155_v6 = vpop.permute.xlu1 %1154  ;;  %1615 = vmatmul.mubr.msk.f32.vlgmr.msra.gmra.mrb[4].mxu0 %vm944_vm14, %v2101_v60  ;;  %1616 = vmatmul.mubr.msk.f32.vlgmr.msra.gmra.mrb[4].mxu1 %vm944_vm14, %v2101_v60 }
 0x205   : > { %1694 = vmatprep.subr.bf16.mxu0 %v1693_v21  ;;  %1710 = vmatprep.subr.bf16.mxu1 %v1669_v32  ;;  %v1157_v17 = vsel %vm506_vm3, %v1155_v6, %v1153_v14  ;;  %v1156_v59 = vsel %vm506_vm3, %v1153_v14, %v1155_v6 }
 0x206   : > { %1696 = vmatpush1.bf16.msra.mxu0 %v1695_v5  ;;  %1712 = vmatpush1.bf16.msra.mxu1 %v1671_v37  ;;  %v1159_v22 = vmul.f32 %v1157_v17, %v1912_v19  ;;  %v1158_v28 = vmul.f32 %v1156_v59, %v1908_v18 }
 0x207   : > { %1698 = vmatprep.subr.bf16.mxu0 %v1697_v13  ;;  %1714 = vmatprep.subr.bf16.mxu1 %v1713_v20 }
 0x208   : > { %v1163_v16 = vpop.permute.xlu1 %1162  ;;  %1232 = vmatprep.mubr.f32.mxu0 %v1757_v0  ;;  %1313 = vmatprep.mubr.f32.mxu1 %v1757_v0  ;;  %v1705_v11 = vpack.c.bf16 %v1159_v22, %v1151_v26  ;;  %v1707_v35 = vpack.c.bf16 %v1158_v28, %v1150_v34 }
 0x209   : > { %v1164_v12 = vsel %vm506_vm3, %v1161_v31, %v1163_v16  ;;  %v1165_v62 = vsel %vm506_vm3, %v1163_v16, %v1161_v31  ;;  %vm1431_vm3 = vcmask 1041408  }
 0x20a   : > { %v1167_v25 = vmul.f32 %v1165_v62, %v1912_v19  ;;  %1700 = vmatpush1.bf16.msra.mxu0 %v1699_v2  ;;  %1716 = vmatpush1.bf16.msra.mxu1 %v1715_v15  ;;  %v1166_v29 = vmul.f32 %v1164_v12, %v1908_v18 }
 0x20b   : > { %1702 = vmatprep.subr.bf16.mxu0 %v1689_v50  ;;  %1718 = vmatprep.subr.bf16.mxu1 %v1717_v61 }
 0x20c   : > { %v1244_v30 = vpop.permute.xlu1 %1243  ;;  %v1721_v32 = vpack.c.bf16 %v1167_v25, %v1159_v22  ;;  %v1723_v36 = vpack.c.bf16 %v1166_v29, %v1158_v28  ;;  %v1420_v22 = vld [vmem:[%s2193_s12] sm:$0xf] }
 0x20d   : > { %v1246_v19 = vsel %vm526_vm5, %v1244_v30, %v1242_v33  ;;  %v1245_v4 = vsel %vm526_vm5, %v1242_v33, %v1244_v30 }
 0x20e   : > { %1704 = vmatpush1.bf16.msra.mxu0 %v1691_v56  ;;  %1720 = vmatpush1.bf16.msra.mxu1 %v1719_v27  ;;  %v1248_v7 = vmul.f32 %v1246_v19, %v1924_v24  ;;  %v1247_v18 = vmul.f32 %v1245_v4, %v1941_v39 }
 0x20f   : > { %1706 = vmatprep.subr.bf16.mxu0 %v1705_v11  ;;  %1722 = vmatprep.subr.bf16.mxu1 %v1721_v32 }
 0x212   : > { %1708 = vmatpush1.bf16.msra.mxu0 %v1707_v35  ;;  %1724 = vmatpush1.bf16.msra.mxu1 %v1723_v36 }
 0x213   : > { %1184 = vmatprep.subr.mxu0 %v1167_v25  ;;  %1265 = vmatprep.subr.mxu1 %v1248_v7 }
 0x214   : > { %v942_v38 = vpop.permute.xlu0 %941 }
 0x216   : > { %1185 = vmatpush1.msra.mxu0 %v1166_v29  ;;  %1266 = vmatpush1.msra.mxu1 %v1247_v18 }
 0x217   : > { %1617 = vmatmul.mubr.msk.f32.vlgmr.msra.gmra.mrb[6].mxu0 %vm944_vm14, %v2101_v60  ;;  %1618 = vmatmul.mubr.msk.f32.vlgmr.msra.gmra.mrb[6].mxu1 %vm944_vm14, %v2101_v60 }
 0x218   : > { %1635 = vmatprep.subr.mxu0 %v1757_v0  ;;  %1637 = vmatprep.mubr.msk.f32.mxu0 %vm1767_vm1, %v1757_v0  ;;  %v1340_v2 = vpop.permute.xlu0 %1339 }
 0x21c   : > { %v1425_v12 = vpop.permute.xlu0 %1424 }
 0x2d7   : > { %v1014_v10 = vpop.f32.mrb[4].mxu0  ;;  %v1124_v8 = vpop.f32.mrb[4].mxu1 }
 0x2d8   : > { %v1016_v37 = vpop.f32.mrb[5].mxu0  ;;  %v1126_v24 = vpop.f32.mrb[5].mxu1  ;;  %v2153_v40 = vadd.f32 %v1014_v10, %v942_v38  ;;  %v2155_v42 = vadd.f32 %v1124_v8, %v942_v38 }
 0x2d9   : > { %v2157_v39 = vadd.f32 %v1016_v37, %v942_v38  ;;  %v2159_v44 = vadd.f32 %v1126_v24, %v942_v38 }
 0x2da   : > { %v1019_v45 = vmax.f32 %v2153_v40, 0.0  ;;  %v1129_v46 = vmax.f32 %v2155_v42, 0.0 }
 0x2db   : > { %v1020_v47 = vmax.f32 %v2157_v39, 0.0  ;;  %v1130_v48 = vmax.f32 %v2159_v44, 0.0 }
 0x2dc   : > { %v1322_v41 = vadd.f32 %v1129_v46, %v1019_v45 }
 0x2dd   : > { %v1323_v57 = vadd.f32 %v1130_v48, %v1020_v47 }
 0x2ea   : > { %v1234_v49 = vpop.f32.mrb[6].mxu0  ;;  %v1315_v50 = vpop.f32.mrb[6].mxu1 }
 0x2eb   : > { %v1235_v51 = vadd.f32 %v1234_v49, %v942_v38  ;;  %v1316_v52 = vadd.f32 %v1315_v50, %v942_v38  ;;  %v1236_v53 = vpop.f32.mrb[7].mxu0  ;;  %v1317_v54 = vpop.f32.mrb[7].mxu1 }
 0x2ec   : > { %v1237_v55 = vadd.f32 %v1236_v53, %v942_v38  ;;  %v1318_v56 = vadd.f32 %v1317_v54, %v942_v38 }
 0x2ed   : > { %v1239_v43 = vmax.f32 %v1235_v51, 0.0  ;;  %v1320_v60 = vmax.f32 %v1316_v52, 0.0 }
 0x2ee   : > { %v1240_v14 = vmax.f32 %v1237_v55, 0.0  ;;  %v1321_v21 = vmax.f32 %v1318_v56, 0.0 }
 0x2ef   : > { %v1324_v58 = vadd.f32 %v1322_v41, %v1239_v43 }
 0x2f0   : > { %v1325_v3 = vadd.f32 %v1323_v57, %v1240_v14 }
 0x2f1   : > { %v1326_v5 = vadd.f32 %v1324_v58, %v1320_v60 }
 0x2f2   : > { %v1327_v6 = vadd.f32 %v1325_v3, %v1321_v21 }
 0x2f3   : > { %v1329_v13 = vsel %vm1328_vm0, %v1326_v5, 0.0 }
 0x2f4   : > { %v1330_v20 = vsel %vm1328_vm0, %v1327_v6, 0.0 }
 0x2f5   : > { %v1331_v17 = vadd.f32 %v1330_v20, %v1329_v13 }
 0x2f7   : > { %1332 = vadd.xlane.f32.xlu1 %v1331_v17 }
 0x384   : > { %v1333_v15 = vpop.xlane.xlu1 %1332 }
 0x385   : > { %v1334_v31 = vmul.f32 0.0009765625, %v1333_v15 }
 0x387   : > { %1636 = vmatpush3.msk.msra.mxu0 %vm1328_vm0, %v1334_v31 }
 0x388   : > { %1638 = vmatmul.mubr.msk.f32.vlgmr.msra.gmra.mrb[8].mxu0 %vm1342_vm2, %v1335_v1  ;;  %1640 = vmatprep.subr.mxu0 %v1757_v0 }
 0x389   : > { %1642 = vmatprep.mubr.msk.f32.mxu0 %vm1767_vm1, %v1757_v0 }
 0x45b   : > { %v1415_v63 = vpop.f32.mrb[8].mxu0 }
 0x45c   : > { %v1416_v16 = vadd.f32 %v1415_v63, %v1340_v2  ;;  %v1639_v61 = vpop.f32.mrb[9].mxu0 }
 0x45e   : > { %v1419_v59 = vmax.f32 %v1416_v16, 0.0 }
 0x460   : > { %1641 = vmatpush3.msk.msra.mxu0 %vm1431_vm3, %v1419_v59 }
 0x461   : > { %1643 = vmatmul.mubr.msk.f32.vlgmr.msra.gmra.mrb[10].mxu0 %vm1427_vm4, %v1420_v22 }
 0x534   : > { %v1501_v62 = vpop.f32.mrb[10].mxu0 }
 0x535   : > { %v1502_v23 = vadd.f32 %v1501_v62, %v1425_v12  ;;  %v1644_v25 = vpop.f32.mrb[11].mxu0 }
 0x537   : > { %v1623_v9 = vmul.f32 -1.442695, %v1502_v23 }
 0x539   : > { %1745 = vpow2.f32 %v1623_v9 }
 0x543   : > { %v1746_v0 = vpop.eup %1745 }
 0x544   : > { %v1508_v26 = vadd.f32 1.0, %v1746_v0 }
 0x546   : > { %1747 = vrcp.f32 %v1508_v26 }
 0x550   : > { %v1748_v27 = vpop.eup %1747 }
 0x551   : > { %1513 = vperm.xlu0 %1744, %v1748_v27  }
 0x5d0   : > { %v1514_v28 = vpop.permute.xlu0 %1513 }
 0x5d1   : > { %v1516_v29 = vmul.f32 %v1514_v28, %v1019_v45  ;;  %v1517_v30 = vmul.f32 %v1514_v28, %v1020_v47  ;;  %v1518_v32 = vmul.f32 %v1514_v28, %v1129_v46  ;;  %v1519_v33 = vmul.f32 %v1514_v28, %v1130_v48 }
 0x5d2   : > { %v1520_v11 = vmul.f32 %v1514_v28, %v1239_v43  ;;  %v1521_v34 = vmul.f32 %v1514_v28, %v1240_v14  ;;  %v1522_v19 = vmul.f32 %v1514_v28, %v1320_v60  ;;  %v1523_v35 = vmul.f32 %v1514_v28, %v1321_v21 }
 0x5d3   : > { %v1526_v36 = vcombine.low %v1516_v29, %v1517_v30  ;;  %v1531_v4 = vcombine.low %v1518_v32, %v1519_v33 }
 0x5d4   : > { %v1537_v7 = vcombine.low %v1520_v11, %v1521_v34  ;;  %v1543_v18 = vcombine.low %v1522_v19, %v1523_v35 }
 0x5d5   : > { %1528 = vst [vmem:[%s467_s17] sm:$0xff] %v1526_v36  ;;  %1624 = vst [vmem:[%s467_s17 + $0x8] sm:$0xff] %v1531_v4 }
 0x5d6   : > { %1625 = vst [vmem:[%s467_s17 + $0x10] sm:$0xff] %v1537_v7  ;;  %1626 = vst [vmem:[%s467_s17 + $0x18] sm:$0xff] %v1543_v18 }
 0x5d7 PF: > { %s24_s29 = sadd.s32 1, %s1755_s29  }
 0x5d8   : > { %p21_p4 = scmp.ge.s32.totalorder %s24_s29, 4  }
 0x5da   :  { %23 = sbr.rel (!%p21_p4) target bundleno = 1 (0x1), region = 109 }

</bundles_post_ra>
